<compile_context>
chip_gen: v6e
topology: v6e:2x2x1
jax: 0.10.0
libtpu: 0.0.40
codegen_flags: <defaults>
</compile_context>

<pallas_src>
import functools

import jax
import jax.numpy as jnp
from jax import lax
from jax.experimental import pallas as pl
from jax.experimental.pallas import tpu as pltpu

Q = 0.8            # GCE exponent, as in gce(logits, labels, q=0.8)
_LANE = 128        # vreg lane width
_SUB = 8           # vreg sublane count (f32)
# Double-buffered (x + logits) tile budget — sized for v7x's 64 MiB physical
# VMEM (v5e/v6e have 128 MiB, so this is conservative there).
_VMEM_TILE_BUDGET = 24 * 1024 * 1024


def _make_gce_kernel(cin, cout, s_tile, s_sub, need_mask, hw_valid):
    """Builds the per-(batch, pixel-tile) kernel body.

    Refs per grid step:
      w_ref:      (Cout, Cin)    f32, SMEM (scalar-broadcast weights)
      b_ref:      (Cout,)        f32, SMEM
      x_ref:      (Cin, S, 128)  f32, VMEM (batch dim squeezed)
      logits_ref: (Cout, S, 128) VMEM
      part_ref:   (s_sub, 128)   f32, VMEM — lane-dense partial sums of
                                 p_sel**q (wrapper does jnp.sum over all).
    """
    n_chunks = s_tile // s_sub
    tp = s_tile * _LANE  # pixels per tile

    def kernel(w_ref, b_ref, x_ref, logits_ref, part_ref):
        t = pl.program_id(1)

        def chunk(c_idx, acc):
            row0 = pl.multiple_of(c_idx * s_sub, s_sub)
            # One dense (s_sub, 128) slab per input channel.
            xs = [x_ref[ci, pl.ds(row0, s_sub), :] for ci in range(cin)]

            # 1x1 conv over channels, unrolled as scalar-broadcast FMAs (VPU);
            # fine for toy channel counts.
            # TODO(synk): for realistic heads (Cin 64-512, Cout 19-150) push
            # this onto the MXU (w in VMEM + jnp.dot) instead of the unroll.
            rows = []
            m = None
            for co in range(cout):
                r = xs[0] * w_ref[co, 0] + b_ref[co]
                for ci in range(1, cin):
                    r = r + xs[ci] * w_ref[co, ci]
                logits_ref[co, pl.ds(row0, s_sub), :] = r.astype(logits_ref.dtype)
                rows.append(r)
                m = r if m is None else jnp.maximum(m, r)

            # labels = argmax  =>  selected softmax prob = max softmax prob
            #   = 1 / sum_c exp(logit_c - max);  p**q = exp(-q * log(denom)).
            denom = jnp.exp(rows[0] - m)
            for r in rows[1:]:
                denom = denom + jnp.exp(r - m)
            p_pow = jnp.exp((-Q) * jnp.log(denom))          # (s_sub, 128)

            if need_mask:  # static flag: zero padded pixels out of the sum
                sub_ids = lax.broadcasted_iota(jnp.int32, (s_sub, _LANE), 0)
                lane_ids = lax.broadcasted_iota(jnp.int32, (s_sub, _LANE), 1)
                pix = t * tp + (row0 + sub_ids) * _LANE + lane_ids
                p_pow = jnp.where(pix < hw_valid, p_pow, 0.0)

            return acc + p_pow

        acc0 = jnp.zeros((s_sub, _LANE), jnp.float32)
        if n_chunks == 1:
            acc = chunk(0, acc0)
        else:
            acc = lax.fori_loop(0, n_chunks, chunk, acc0)
        part_ref[...] = acc

    return kernel


def _plan_tiling(hw, cin, cout, n_batch, max_tile_pixels):
    """Pick (hw_pad, t_total, s_tile, s_sub, num_t) for lane-dense tiling."""
    hw_pad = -(-hw // _LANE) * _LANE
    t_total = hw_pad // _LANE
    # Keep the sublane count 8-aligned once we need multiple chunks/tiles.
    if t_total > _SUB and t_total % _SUB != 0:
        t_total = -(-t_total // _SUB) * _SUB
        hw_pad = t_total * _LANE

    # Cap the tile so the double-buffered (x + logits) tiles fit the budget.
    tp_cap = max(_LANE, _VMEM_TILE_BUDGET // (2 * (cin + cout) * 4))
    s_max = max(_SUB, min(max_tile_pixels, tp_cap) // _LANE)

    if t_total <= s_max:
        s_tile = t_total
    else:
        s_tile = (s_max // _SUB) * _SUB
        while s_tile > _SUB and t_total % s_tile != 0:
            s_tile -= _SUB
    num_t = t_total // s_tile

    # v7x has 2 TensorCores: avoid a degenerate single-step grid if splittable.
    if n_batch * num_t < 2 and s_tile % (2 * _SUB) == 0:
        s_tile //= 2
        num_t = t_total // s_tile

    # Inner sub-chunk: 16 sublanes when the live set stays well under 64 vregs,
    # else 8; tiny tiles (< 8 sublanes) are processed whole.
    if s_tile % 16 == 0 and (cin + cout) <= 24:
        s_sub = 16
    elif s_tile % _SUB == 0:
        s_sub = _SUB
    else:
        s_sub = s_tile
    return hw_pad, t_total, s_tile, s_sub, num_t


def gce_forward(x_nchw, w, b, *, max_tile_pixels=131072,
                logits_dtype=jnp.float32):
    """Synthetic 1x1-conv head + GCE loss. Returns (logits NCHW, scalar loss).

    logits_dtype=jnp.bfloat16 halves the HBM write traffic (biggest win on
    v5e); in-kernel math stays f32 either way.
    """
    N, Cin, H, W_ = x_nchw.shape
    Cout = w.shape[0]
    HW = H * W_

    hw_pad, t_total, s_tile, s_sub, num_t = _plan_tiling(
        HW, Cin, Cout, N, max_tile_pixels)

    # NCHW is already contiguous as (N, Cin, H*W): free reshape, no transpose.
    x_f = x_nchw.reshape(N, Cin, HW).astype(jnp.float32)
    if hw_pad != HW:
        x_f = jnp.pad(x_f, ((0, 0), (0, 0), (0, hw_pad - HW)))
    # Fold pixels into lane-dense (sublane, lane) slabs — also free.
    x_f = x_f.reshape(N, Cin, t_total, _LANE)
    w_f = w.reshape(Cout, Cin).astype(jnp.float32)
    b_f = b.reshape(Cout).astype(jnp.float32)

    kernel = _make_gce_kernel(Cin, Cout, s_tile, s_sub,
                              need_mask=(hw_pad != HW), hw_valid=HW)
    logits_bytes = jnp.dtype(logits_dtype).itemsize

    logits, partials = pl.pallas_call(
        kernel,
        grid=(N, num_t),
        in_specs=[
            pl.BlockSpec(memory_space=pltpu.SMEM),                        # w
            pl.BlockSpec(memory_space=pltpu.SMEM),                        # b
            pl.BlockSpec((None, Cin, s_tile, _LANE),
                         lambda n, t: (n, 0, t, 0)),                      # x
        ],
        out_specs=[
            pl.BlockSpec((None, Cout, s_tile, _LANE),
                         lambda n, t: (n, 0, t, 0)),                      # logits
            pl.BlockSpec((None, None, s_sub, _LANE),
                         lambda n, t: (n, t, 0, 0)),                      # partial
        ],
        out_shape=(
            jax.ShapeDtypeStruct((N, Cout, t_total, _LANE), logits_dtype),
            jax.ShapeDtypeStruct((N, num_t, s_sub, _LANE), jnp.float32),
        ),
        compiler_params=pltpu.CompilerParams(
            dimension_semantics=("parallel", "parallel"),
            vmem_limit_bytes=48 * 1024 * 1024,
        ),
        cost_estimate=pl.CostEstimate(
            flops=2 * Cout * Cin * N * hw_pad,
            transcendentals=(Cout + 2) * N * hw_pad,
            bytes_accessed=(Cin * 4 + Cout * logits_bytes) * N * hw_pad,
        ),
    )(w_f, b_f, x_f)

    # loss = mean((1 - p_sel**q) / q) = (1 - mean(p_sel**q)) / q  (valid pixels).
    p_pow_sum = jnp.sum(partials)
    loss = (1.0 - p_pow_sum / (N * HW)) / Q

    logits = logits.reshape(N, Cout, hw_pad)
    if hw_pad != HW:
        logits = logits[:, :, :HW]
    return logits.reshape(N, Cout, H, W_), loss


class GCE:
    """Pallas port of the GCE test-time-adaptation wrapper (forward pass only)."""

    def __init__(self, w, b, steps=1, episodic=False):
        assert steps > 0, "GCE requires >= 1 step(s) to forward and update"
        self.w = w
        self.b = b
        self.steps = steps
        self.episodic = episodic
        # Saved copies for reset(), mirroring copy_model_and_optimizer.
        self._w0, self._b0 = w, b
        self.last_loss = None

    def reset(self):
        self.w, self.b = self._w0, self._b0

    def forward(self, x):
        if self.episodic:
            self.reset()
        outputs, loss, count = None, None, 0
        for count in range(self.steps):
            outputs, loss = gce_forward(x, self.w, self.b)
            # TODO(synk): loss.backward() + optimizer.step() (gradient-based
            # test-time adaptation of the wrapped model) has no clean
            # forward-only Pallas equivalent; only forward outputs + GCE loss
            # are computed here.
        self.last_loss = loss
        return (outputs, [False, None, None, None, count])


def _reference(x, w, b):
    logits = jnp.einsum("oc,nchw->nohw", w, x) + b[None, :, None, None]
    probs = jax.nn.softmax(logits, axis=1)
    p_sel = jnp.max(probs, axis=1)                  # prob at the argmax class
    loss = jnp.mean((1.0 - p_sel ** Q) / Q)
    return logits, loss


if __name__ == "__main__":
    key = jax.random.PRNGKey(0)
    kx, kw, kb, kx2 = jax.random.split(key, 4)

    # Small shapes consistent with the module's NCHW segmentation logits.
    N, Cin, H, W_ = 2, 4, 16, 16
    Cout = 4  # number of classes

    x = jax.random.normal(kx, (N, Cin, H, W_), dtype=jnp.float32)
    w = jax.random.normal(kw, (Cout, Cin), dtype=jnp.float32) * 0.1
    b = jax.random.normal(kb, (Cout,), dtype=jnp.float32) * 0.01

    module = GCE(w, b, steps=1, episodic=False)
    outputs, info = module.forward(x)
    outputs = jax.block_until_ready(outputs)
    loss = jax.block_until_ready(module.last_loss)

    logits_ref, loss_ref = _reference(x, w, b)
    assert outputs.shape == (N, Cout, H, W_)
    assert bool(jnp.isfinite(loss))
    assert jnp.allclose(outputs, logits_ref, rtol=1e-4, atol=1e-4)
    assert jnp.allclose(loss, loss_ref, rtol=1e-4, atol=1e-5)

    # Second check: non-128-aligned spatial size exercises the pad+mask path.
    H2 = W2 = 15
    x2 = jax.random.normal(kx2, (N, Cin, H2, W2), dtype=jnp.float32)
    out2, loss2 = gce_forward(x2, w, b)
    out2 = jax.block_until_ready(out2)
    loss2 = jax.block_until_ready(loss2)
    logits_ref2, loss_ref2 = _reference(x2, w, b)
    assert out2.shape == (N, Cout, H2, W2)
    assert jnp.allclose(out2, logits_ref2, rtol=1e-4, atol=1e-4)
    assert jnp.allclose(loss2, loss_ref2, rtol=1e-4, atol=1e-5)

    print("KERNEL_OK")
</pallas_src>

<mosaic_0001>
module attributes {stable_mosaic.version = 11 : i64} {
  func.func @kernel(%arg0: i32, %arg1: i32, %arg2: memref<4x4xf32, #tpu.memory_space<smem>>, %arg3: memref<4xf32, #tpu.memory_space<smem>>, %arg4: memref<1x4x2x128xf32, #tpu.memory_space<vmem>>, %arg5: memref<1x4x2x128xf32, #tpu.memory_space<vmem>>, %arg6: memref<1x1x2x128xf32, #tpu.memory_space<vmem>>) attributes {dimension_semantics = [#tpu.dimension_semantics<parallel>, #tpu.dimension_semantics<parallel>], iteration_bounds = array<i64: 2, 1>, scalar_prefetch = 0 : i64, scratch_operands = 0 : i64, tpu.core_type = #tpu.core_type<tc>, window_params = [{transform_indices = @transform_0, window_bounds = array<i64: 4, 4>}, {transform_indices = @transform_1, window_bounds = array<i64: 4>}, {transform_indices = @transform_2, window_bounds = array<i64: 1, 4, 2, 128>}, {transform_indices = @transform_3, window_bounds = array<i64: 1, 4, 2, 128>}, {transform_indices = @transform_4, window_bounds = array<i64: 1, 1, 2, 128>}]} {
    %cst = arith.constant 0.000000e+00 : f32
    %0 = vector.broadcast %cst : f32 to vector<2x128xf32>
    %c0_i32 = arith.constant 0 : i32
    %1 = tpu.assume_multiple %c0_i32, 2 : i32
    %c0 = arith.constant 0 : index
    %c0_0 = arith.constant 0 : index
    %2 = arith.index_cast %1 : i32 to index
    %c0_1 = arith.constant 0 : index
    %3 = vector.load %arg4[%c0, %c0_0, %2, %c0_1] : memref<1x4x2x128xf32, #tpu.memory_space<vmem>>, vector<1x1x2x128xf32>
    %4 = vector.shape_cast %3 : vector<1x1x2x128xf32> to vector<2x128xf32>
    %c0_2 = arith.constant 0 : index
    %c1 = arith.constant 1 : index
    %5 = arith.index_cast %1 : i32 to index
    %c0_3 = arith.constant 0 : index
    %6 = vector.load %arg4[%c0_2, %c1, %5, %c0_3] : memref<1x4x2x128xf32, #tpu.memory_space<vmem>>, vector<1x1x2x128xf32>
    %7 = vector.shape_cast %6 : vector<1x1x2x128xf32> to vector<2x128xf32>
    %c0_4 = arith.constant 0 : index
    %c2 = arith.constant 2 : index
    %8 = arith.index_cast %1 : i32 to index
    %c0_5 = arith.constant 0 : index
    %9 = vector.load %arg4[%c0_4, %c2, %8, %c0_5] : memref<1x4x2x128xf32, #tpu.memory_space<vmem>>, vector<1x1x2x128xf32>
    %10 = vector.shape_cast %9 : vector<1x1x2x128xf32> to vector<2x128xf32>
    %c0_6 = arith.constant 0 : index
    %c3 = arith.constant 3 : index
    %11 = arith.index_cast %1 : i32 to index
    %c0_7 = arith.constant 0 : index
    %12 = vector.load %arg4[%c0_6, %c3, %11, %c0_7] : memref<1x4x2x128xf32, #tpu.memory_space<vmem>>, vector<1x1x2x128xf32>
    %13 = vector.shape_cast %12 : vector<1x1x2x128xf32> to vector<2x128xf32>
    %c0_8 = arith.constant 0 : index
    %c0_9 = arith.constant 0 : index
    %14 = memref.load %arg2[%c0_8, %c0_9] : memref<4x4xf32, #tpu.memory_space<smem>>
    %15 = vector.broadcast %14 : f32 to vector<2x128xf32>
    %16 = arith.mulf %4, %15 : vector<2x128xf32>
    %c0_10 = arith.constant 0 : index
    %17 = memref.load %arg3[%c0_10] : memref<4xf32, #tpu.memory_space<smem>>
    %18 = vector.broadcast %17 : f32 to vector<2x128xf32>
    %19 = arith.addf %16, %18 : vector<2x128xf32>
    %c0_11 = arith.constant 0 : index
    %c1_12 = arith.constant 1 : index
    %20 = memref.load %arg2[%c0_11, %c1_12] : memref<4x4xf32, #tpu.memory_space<smem>>
    %21 = vector.broadcast %20 : f32 to vector<2x128xf32>
    %22 = arith.mulf %7, %21 : vector<2x128xf32>
    %23 = arith.addf %19, %22 : vector<2x128xf32>
    %c0_13 = arith.constant 0 : index
    %c2_14 = arith.constant 2 : index
    %24 = memref.load %arg2[%c0_13, %c2_14] : memref<4x4xf32, #tpu.memory_space<smem>>
    %25 = vector.broadcast %24 : f32 to vector<2x128xf32>
    %26 = arith.mulf %10, %25 : vector<2x128xf32>
    %27 = arith.addf %23, %26 : vector<2x128xf32>
    %c0_15 = arith.constant 0 : index
    %c3_16 = arith.constant 3 : index
    %28 = memref.load %arg2[%c0_15, %c3_16] : memref<4x4xf32, #tpu.memory_space<smem>>
    %29 = vector.broadcast %28 : f32 to vector<2x128xf32>
    %30 = arith.mulf %13, %29 : vector<2x128xf32>
    %31 = arith.addf %27, %30 : vector<2x128xf32>
    %c0_17 = arith.constant 0 : index
    %c0_18 = arith.constant 0 : index
    %32 = arith.index_cast %1 : i32 to index
    %c0_19 = arith.constant 0 : index
    %33 = vector.load %arg5[%c0_17, %c0_18, %32, %c0_19] : memref<1x4x2x128xf32, #tpu.memory_space<vmem>>, vector<1x1x2x128xf32>
    %34 = vector.shape_cast %33 : vector<1x1x2x128xf32> to vector<2x128xf32>
    %35 = vector.shape_cast %31 : vector<2x128xf32> to vector<1x1x2x128xf32>
    tpu.vector_store %arg5[%c0_17, %c0_18, %32, %c0_19], %35 {strides = array<i32>} : memref<1x4x2x128xf32, #tpu.memory_space<vmem>>, vector<1x1x2x128xf32>,
    %c1_20 = arith.constant 1 : index
    %c0_21 = arith.constant 0 : index
    %36 = memref.load %arg2[%c1_20, %c0_21] : memref<4x4xf32, #tpu.memory_space<smem>>
    %37 = vector.broadcast %36 : f32 to vector<2x128xf32>
    %38 = arith.mulf %4, %37 : vector<2x128xf32>
    %c1_22 = arith.constant 1 : index
    %39 = memref.load %arg3[%c1_22] : memref<4xf32, #tpu.memory_space<smem>>
    %40 = vector.broadcast %39 : f32 to vector<2x128xf32>
    %41 = arith.addf %38, %40 : vector<2x128xf32>
    %c1_23 = arith.constant 1 : index
    %c1_24 = arith.constant 1 : index
    %42 = memref.load %arg2[%c1_23, %c1_24] : memref<4x4xf32, #tpu.memory_space<smem>>
    %43 = vector.broadcast %42 : f32 to vector<2x128xf32>
    %44 = arith.mulf %7, %43 : vector<2x128xf32>
    %45 = arith.addf %41, %44 : vector<2x128xf32>
    %c1_25 = arith.constant 1 : index
    %c2_26 = arith.constant 2 : index
    %46 = memref.load %arg2[%c1_25, %c2_26] : memref<4x4xf32, #tpu.memory_space<smem>>
    %47 = vector.broadcast %46 : f32 to vector<2x128xf32>
    %48 = arith.mulf %10, %47 : vector<2x128xf32>
    %49 = arith.addf %45, %48 : vector<2x128xf32>
    %c1_27 = arith.constant 1 : index
    %c3_28 = arith.constant 3 : index
    %50 = memref.load %arg2[%c1_27, %c3_28] : memref<4x4xf32, #tpu.memory_space<smem>>
    %51 = vector.broadcast %50 : f32 to vector<2x128xf32>
    %52 = arith.mulf %13, %51 : vector<2x128xf32>
    %53 = arith.addf %49, %52 : vector<2x128xf32>
    %c0_29 = arith.constant 0 : index
    %c1_30 = arith.constant 1 : index
    %54 = arith.index_cast %1 : i32 to index
    %c0_31 = arith.constant 0 : index
    %55 = vector.load %arg5[%c0_29, %c1_30, %54, %c0_31] : memref<1x4x2x128xf32, #tpu.memory_space<vmem>>, vector<1x1x2x128xf32>
    %56 = vector.shape_cast %55 : vector<1x1x2x128xf32> to vector<2x128xf32>
    %57 = vector.shape_cast %53 : vector<2x128xf32> to vector<1x1x2x128xf32>
    tpu.vector_store %arg5[%c0_29, %c1_30, %54, %c0_31], %57 {strides = array<i32>} : memref<1x4x2x128xf32, #tpu.memory_space<vmem>>, vector<1x1x2x128xf32>,
    %58 = arith.maximumf %31, %53 : vector<2x128xf32>
    %c2_32 = arith.constant 2 : index
    %c0_33 = arith.constant 0 : index
    %59 = memref.load %arg2[%c2_32, %c0_33] : memref<4x4xf32, #tpu.memory_space<smem>>
    %60 = vector.broadcast %59 : f32 to vector<2x128xf32>
    %61 = arith.mulf %4, %60 : vector<2x128xf32>
    %c2_34 = arith.constant 2 : index
    %62 = memref.load %arg3[%c2_34] : memref<4xf32, #tpu.memory_space<smem>>
    %63 = vector.broadcast %62 : f32 to vector<2x128xf32>
    %64 = arith.addf %61, %63 : vector<2x128xf32>
    %c2_35 = arith.constant 2 : index
    %c1_36 = arith.constant 1 : index
    %65 = memref.load %arg2[%c2_35, %c1_36] : memref<4x4xf32, #tpu.memory_space<smem>>
    %66 = vector.broadcast %65 : f32 to vector<2x128xf32>
    %67 = arith.mulf %7, %66 : vector<2x128xf32>
    %68 = arith.addf %64, %67 : vector<2x128xf32>
    %c2_37 = arith.constant 2 : index
    %c2_38 = arith.constant 2 : index
    %69 = memref.load %arg2[%c2_37, %c2_38] : memref<4x4xf32, #tpu.memory_space<smem>>
    %70 = vector.broadcast %69 : f32 to vector<2x128xf32>
    %71 = arith.mulf %10, %70 : vector<2x128xf32>
    %72 = arith.addf %68, %71 : vector<2x128xf32>
    %c2_39 = arith.constant 2 : index
    %c3_40 = arith.constant 3 : index
    %73 = memref.load %arg2[%c2_39, %c3_40] : memref<4x4xf32, #tpu.memory_space<smem>>
    %74 = vector.broadcast %73 : f32 to vector<2x128xf32>
    %75 = arith.mulf %13, %74 : vector<2x128xf32>
    %76 = arith.addf %72, %75 : vector<2x128xf32>
    %c0_41 = arith.constant 0 : index
    %c2_42 = arith.constant 2 : index
    %77 = arith.index_cast %1 : i32 to index
    %c0_43 = arith.constant 0 : index
    %78 = vector.load %arg5[%c0_41, %c2_42, %77, %c0_43] : memref<1x4x2x128xf32, #tpu.memory_space<vmem>>, vector<1x1x2x128xf32>
    %79 = vector.shape_cast %78 : vector<1x1x2x128xf32> to vector<2x128xf32>
    %80 = vector.shape_cast %76 : vector<2x128xf32> to vector<1x1x2x128xf32>
    tpu.vector_store %arg5[%c0_41, %c2_42, %77, %c0_43], %80 {strides = array<i32>} : memref<1x4x2x128xf32, #tpu.memory_space<vmem>>, vector<1x1x2x128xf32>,
    %81 = arith.maximumf %58, %76 : vector<2x128xf32>
    %c3_44 = arith.constant 3 : index
    %c0_45 = arith.constant 0 : index
    %82 = memref.load %arg2[%c3_44, %c0_45] : memref<4x4xf32, #tpu.memory_space<smem>>
    %83 = vector.broadcast %82 : f32 to vector<2x128xf32>
    %84 = arith.mulf %4, %83 : vector<2x128xf32>
    %c3_46 = arith.constant 3 : index
    %85 = memref.load %arg3[%c3_46] : memref<4xf32, #tpu.memory_space<smem>>
    %86 = vector.broadcast %85 : f32 to vector<2x128xf32>
    %87 = arith.addf %84, %86 : vector<2x128xf32>
    %c3_47 = arith.constant 3 : index
    %c1_48 = arith.constant 1 : index
    %88 = memref.load %arg2[%c3_47, %c1_48] : memref<4x4xf32, #tpu.memory_space<smem>>
    %89 = vector.broadcast %88 : f32 to vector<2x128xf32>
    %90 = arith.mulf %7, %89 : vector<2x128xf32>
    %91 = arith.addf %87, %90 : vector<2x128xf32>
    %c3_49 = arith.constant 3 : index
    %c2_50 = arith.constant 2 : index
    %92 = memref.load %arg2[%c3_49, %c2_50] : memref<4x4xf32, #tpu.memory_space<smem>>
    %93 = vector.broadcast %92 : f32 to vector<2x128xf32>
    %94 = arith.mulf %10, %93 : vector<2x128xf32>
    %95 = arith.addf %91, %94 : vector<2x128xf32>
    %c3_51 = arith.constant 3 : index
    %c3_52 = arith.constant 3 : index
    %96 = memref.load %arg2[%c3_51, %c3_52] : memref<4x4xf32, #tpu.memory_space<smem>>
    %97 = vector.broadcast %96 : f32 to vector<2x128xf32>
    %98 = arith.mulf %13, %97 : vector<2x128xf32>
    %99 = arith.addf %95, %98 : vector<2x128xf32>
    %c0_53 = arith.constant 0 : index
    %c3_54 = arith.constant 3 : index
    %100 = arith.index_cast %1 : i32 to index
    %c0_55 = arith.constant 0 : index
    %101 = vector.load %arg5[%c0_53, %c3_54, %100, %c0_55] : memref<1x4x2x128xf32, #tpu.memory_space<vmem>>, vector<1x1x2x128xf32>
    %102 = vector.shape_cast %101 : vector<1x1x2x128xf32> to vector<2x128xf32>
    %103 = vector.shape_cast %99 : vector<2x128xf32> to vector<1x1x2x128xf32>
    tpu.vector_store %arg5[%c0_53, %c3_54, %100, %c0_55], %103 {strides = array<i32>} : memref<1x4x2x128xf32, #tpu.memory_space<vmem>>, vector<1x1x2x128xf32>,
    %104 = arith.maximumf %81, %99 : vector<2x128xf32>
    %105 = arith.subf %31, %104 : vector<2x128xf32>
    %106 = math.exp %105 : vector<2x128xf32>
    %107 = arith.subf %53, %104 : vector<2x128xf32>
    %108 = math.exp %107 : vector<2x128xf32>
    %109 = arith.addf %106, %108 : vector<2x128xf32>
    %110 = arith.subf %76, %104 : vector<2x128xf32>
    %111 = math.exp %110 : vector<2x128xf32>
    %112 = arith.addf %109, %111 : vector<2x128xf32>
    %113 = arith.subf %99, %104 : vector<2x128xf32>
    %114 = math.exp %113 : vector<2x128xf32>
    %115 = arith.addf %112, %114 : vector<2x128xf32>
    %116 = math.log %115 : vector<2x128xf32>
    %cst_56 = arith.constant -8.000000e-01 : f32
    %117 = vector.broadcast %cst_56 : f32 to vector<2x128xf32>
    %118 = arith.mulf %117, %116 : vector<2x128xf32>
    %119 = math.exp %118 : vector<2x128xf32>
    %120 = arith.addf %0, %119 : vector<2x128xf32>
    %c0_57 = arith.constant 0 : index
    %c0_58 = arith.constant 0 : index
    %c0_59 = arith.constant 0 : index
    %c0_60 = arith.constant 0 : index
    %121 = vector.load %arg6[%c0_57, %c0_58, %c0_59, %c0_60] : memref<1x1x2x128xf32, #tpu.memory_space<vmem>>, vector<1x1x2x128xf32>
    %122 = vector.shape_cast %121 : vector<1x1x2x128xf32> to vector<2x128xf32>
    %123 = vector.shape_cast %120 : vector<2x128xf32> to vector<1x1x2x128xf32>
    tpu.vector_store %arg6[%c0_57, %c0_58, %c0_59, %c0_60], %123 {strides = array<i32>} : memref<1x1x2x128xf32, #tpu.memory_space<vmem>>, vector<1x1x2x128xf32>,
    return
  }
  func.func @transform_0(%arg0: i32, %arg1: i32) -> (i32, i32) {
    %c0_i32 = arith.constant 0 : i32
    %c0_i32_0 = arith.constant 0 : i32
    %c0_i32_1 = arith.constant 0 : i32
    return %c0_i32, %c0_i32_0 : i32, i32
  }
  func.func @transform_1(%arg0: i32, %arg1: i32) -> i32 {
    %c0_i32 = arith.constant 0 : i32
    %c0_i32_0 = arith.constant 0 : i32
    return %c0_i32 : i32
  }
  func.func @transform_2(%arg0: i32, %arg1: i32) -> (i32, i32, i32, i32) {
    %c0_i32 = arith.constant 0 : i32
    %c0_i32_0 = arith.constant 0 : i32
    %c0_i32_1 = arith.constant 0 : i32
    return %arg0, %c0_i32, %arg1, %c0_i32_0 : i32, i32, i32, i32
  }
  func.func @transform_3(%arg0: i32, %arg1: i32) -> (i32, i32, i32, i32) {
    %c0_i32 = arith.constant 0 : i32
    %c0_i32_0 = arith.constant 0 : i32
    %c0_i32_1 = arith.constant 0 : i32
    return %arg0, %c0_i32, %arg1, %c0_i32_0 : i32, i32, i32, i32
  }
  func.func @transform_4(%arg0: i32, %arg1: i32) -> (i32, i32, i32, i32) {
    %c0_i32 = arith.constant 0 : i32
    %c0_i32_0 = arith.constant 0 : i32
    %c0_i32_1 = arith.constant 0 : i32
    return %arg0, %arg1, %c0_i32, %c0_i32_0 : i32, i32, i32, i32
  }
}

</mosaic_0001>

<bundles_post_ra>
// kernel: tpu_custom_call.1
= control target key start
LH: loop header
LB: loop body
LE: loop exit
PB: predicated region body
PF: predicated region fallthrough
CT: control target
= control target key end

     0   :  { %s1165_s0 = inlined_call_operand.hbm [shape: f32[4,4], index: 0, kind: input, shape index: {}]   ;;  %s1166_s1 = inlined_call_operand.vmem [shape: f32[4], index: 1, kind: input, shape index: {}]   ;;  %s1167_s2 = inlined_call_operand.hbm [shape: f32[2,4,2,128], index: 2, kind: input, shape index: {}]   ;;  %s1168_s3 = inlined_call_operand.hbm [shape: f32[2,4,2,128], index: 3, kind: output, shape index: {0}]   ;;  %s1169_s4 = inlined_call_operand.hbm [shape: f32[2,1,2,128], index: 4, kind: output, shape index: {1}]  }
   0x1   :  { %1171 = sst [smem:[#allocation17_spill]] %s1165_s0 }
   0x2   :  { %1172 = sst [smem:[#allocation18_spill]] %s1166_s1 }
   0x3   :  { %10 = vsyncpa [#allocation5], 0 }
   0x4   :  { %11 = vsyncpa [#allocation6], 0 }
   0x5   :  { %12 = vsyncpa [#allocation3], 0 }
   0x6   :  { %14 = vsyncpa [#allocation3 + $0x1], 0 }
   0x7   :  { %15 = vsyncpa [#allocation4], 0 }
   0x8   :  { %17 = vsyncpa [#allocation4 + $0x1], 0 }
   0x9   :  { %18 = vsyncpa [#allocation11], 0 }
   0xa   :  { %20 = vsyncpa [#allocation11 + $0x1], 0  ;;  %s927_s15 = smov 0   ;;  %s929_s16 = smov 0  }
   0xb   :  { %s931_s17 = smov 0   ;;  %s933_s18 = smov 0  }
   0xc   :  { %s935_s19 = smov 0   ;;  %s937_s20 = smov 0  }
   0xd LB: > { %s567_s21 = sadd.s32 4294967295, %s891_s20   ;;  %s568_s22 = sadd.s32 4294967294, %s891_s20   ;;  %s891_s20 = sphi %s937_s20, %s26_s20   ;;  %s887_s19 = sphi %s935_s19, %s1189_s19   ;;  %s883_s18 = sphi %s933_s18, %s1188_s18   ;;  %s879_s17 = sphi %s931_s17, %s1187_s17   ;;  %s875_s16 = sphi %s929_s16, %s1186_s16   ;;  %s871_s15 = sphi %s927_s15, %s1185_s15  }
   0xe   : > { %s89_s23 = sadd.s32 1, %s879_s17  ;;  %p96_p0 = scmp.ne.s32.totalorder %s879_s17, %s875_s16 }
   0xf   : > { %p97_p1 = scmp.eq.s32.totalorder %s891_s20, 0  ;;  %p102_p2 = scmp.ne.s32.totalorder %s875_s16, %s871_s15 }
  0x10   : > { %p965_p3 = scmp.eq.s32.totalorder %s567_s21, 0  ;;  %p128_p4 = scmp.eq.s32.totalorder %s567_s21, 1 }
  0x11   : > { %p98_p5 = por %p97_p1, %p96_p0  ;;  %p134_p6 = scmp.eq.s32.totalorder %s568_s22, 1 }
  0x12   : > { %p971_p7 = por %p965_p3, %p102_p2  ;;  %p975_p8 = por %p128_p4, %p96_p0 }
  0x13   : > { %p979_p9 = por %p134_p6, %p102_p2  ;;  %p569_p10 = scmp.ge.s32.totalorder %s891_s20, 1 }
  0x14   : > { %s1175_s26 = scalar_select %p975_p8, 1, 0 }
  0x15   : > { %s1176_s27 = scalar_select %p979_p9, 1, 0 }
  0x16   : > { %p169_p11 = scmp.lt.s32.totalorder %s891_s20, 3  ;;  %p649_p1 = scmp.lt.s32.totalorder %s891_s20, 2 }
  0x17   : > { %s1178_s1 = sld [smem:[#allocation18_spill]]  ;;  %s202_s8 = sand.u32 1, %s879_s17  }
  0x18   : > { %p986_p13 = pnand %p569_p10, %p169_p11  ;;  %p996_p4 = pnand %p649_p1, %p98_p5 }
  0x19   : > { %s38_s9 = sadd.s32 1, %s887_s19  ;;  %s893_s10 = smov [#allocation2]  }
  0x1a   : > { %p629_p0 = pneg %p986_p13  ;;  %s1181_s0 = sld [smem:[#allocation17_spill]] }
  0x1c   : > { %p1002_p2 = pnand %p629_p0, %p965_p3 }
  0x1d   : > { %s191_s5 = sshll.u32 %s1178_s1, 4  ;;  %s192_s5 = int_to_ptr.vmem [resolvable:$true] %s191_s5 }
  0x1e   : > { %s730_s13 = scalar_lea.vmem %s192_s5, 16  ;;  %p732_p6 = pneg %p1002_p2 }
  0x1f   : > { %p731_p5 = scmp.ne.s32.totalorder %s192_s5, %s730_s13  ;;  %p738_p1 = scmp.lt.s32.totalorder %s192_s5, %s192_s5 }
  0x20   : > { %632 = dma.hbm_to_smem (!%p1002_p2), %s1181_s0, 64, %s893_s10, [#allocation5]  }
  0x21   : > { %p733_p10 = pnand %p732_p6, %p731_p5  ;;  %p739_p0 = scmp.lt.s32.totalorder %s730_s13, %s730_s13 }
  0x23   : > { %p734_p11 = pneg %p733_p10  ;;  %p740_p12 = por %p739_p0, %p738_p1 }
  0x25   : > { %p741_p9 = pnand %p740_p12, %p734_p11 }
  0x27   : > { %744 = shalt.err (!%p741_p9)
}
  0x28   : > { %s894_s14 = smov [#allocation7]   ;;  %p40_p8 = scmp.ge.s32.totalorder %s38_s9, 2 }
  0x29   : > { %635 = dma.vmem_to_smem (!%p1002_p2), %s192_s5, 16, %s894_s14, [#allocation6]  }
  0x2a   : > { %s573_s21 = sshll.u32 %s202_s8, 3  ;;  %s613_s22 = sshll.u32 %s887_s19, 7 }
  0x2b   : > { %s1191_s9 = smov (%p40_p8, %s38_s9), 0  ;;  %s213_s10 = scalar_lea.hbm %s1167_s2, %s613_s22 }
  0x2c   : > { %s84_s11 = ssub.s32 %s887_s19, %s1191_s9  ;;  %s206_s12 = scalar_lea.vmem [#allocation8], %s573_s21 }
  0x2d   : > { %s214_s13 = sshll.u32 %s206_s12, 4  ;;  %p87_p9 = scmp.eq.s32.totalorder %s84_s11, 0  ;;  %s215_s13 = int_to_ptr.vmem [resolvable:$true] %s214_s13 }
  0x2e   : > { %s203_s0 = scalar_lea.sflag [#allocation3], %s202_s8  ;;  %p747_p12 = pneg %p996_p4 }
  0x2f   : > { %s1028_s7 = scalar_select %p87_p9, %s879_s17, %s89_s23  }
  0x30   : > { %s758_s5 = scalar_lea.vmem %s215_s13, 128  ;;  %s895_s14 = smov [#allocation8]  }
  0x31   : > { %p759_p2 = scmp.ne.s32.totalorder %s215_s13, %s758_s5  ;;  %s763_s1 = sshll.u32 %s895_s14, 4  ;;  %s764_s1 = int_to_ptr.vmem [resolvable:$false] %s763_s1 }
  0x32   : > { %s765_s29 = scalar_lea.vmem %s764_s1, 256  ;;  %p766_p6 = scmp.lt.s32.totalorder %s215_s13, %s764_s1 }
  0x33   : > { %p761_p8 = pnand %p759_p2, %p747_p12  ;;  %p767_p10 = scmp.lt.s32.totalorder %s765_s29, %s758_s5 }
  0x35   : > { %p762_p5 = pneg %p761_p8  ;;  %p768_p11 = por %p767_p10, %p766_p6 }
  0x37   : > { %p769_p1 = pnand %p768_p11, %p762_p5 }
  0x39   : > { %772 = shalt.err (!%p769_p1)
}
  0x3a   : > { %s896_s21 = smov 32   ;;  %s897_s23 = smov 2  }
  0x3b   : > { %639 = dma.hbm_to_vmem [thread:$0]  (!%p996_p4), %s213_s10, 128, %s215_s13, %s203_s0, %s896_s21, %s896_s21, %s897_s23  }
  0x3c   : > { %226 = sbr.rel (%p986_p13) target bundleno = 190 (0xbe), region = 32 }
  0x41   : > { %850 = dma.done.wait (%p965_p3), [#allocation5], 64  }
  0x42   : > { %852 = vsyncadd (%p965_p3), [#allocation5], 4294967232 }
  0x43   : > { %854 = dma.done.wait (%p965_p3), [#allocation6], 16  }
  0x44   : > { %856 = vsyncadd (%p965_p3), [#allocation6], 4294967280  ;;  %s1045_s1 = sand.u32 1, %s875_s16  }
  0x45   : > { %s579_s0 = sshll.u32 %s1045_s1, 3  ;;  %s237_s28 = scalar_lea.sflag [#allocation3], %s1045_s1 }
  0x46   : > { %s240_s6 = scalar_lea.vmem [#allocation8], %s579_s0 }
  0x47   : > { %858 = dma.done.wait (%p971_p7), %s237_s28, 128  }
  0x48   : > { %860 = vsyncadd (%p971_p7), %s237_s28, 4294967168 }
  0x49   : > { %245 = sfence }
  0x4a   : > { %s281_s8 = sld [smem:[#allocation2]]  ;;  %v271_v0 = vld [vmem:[%s240_s6] sm:$0x3]  ;;  %v1055_v1 = vld [vmem:[%s240_s6 + $0x2] sm:$0x3]  ;;  %p1182_p7 = scmp.ne.s32.totalorder %s1175_s26, 0 }
  0x4b   : > { %s284_s24 = sld [smem:[#allocation7]]  ;;  %v1057_v3 = vld [vmem:[%s240_s6 + $0x4] sm:$0x3]  ;;  %v1059_v6 = vld [vmem:[%s240_s6 + $0x6] sm:$0x3] }
  0x4c   : > { %s585_s22 = sld [smem:[#allocation2 + $0x1]] }
  0x4d   : > { %s586_s30 = sld [smem:[#allocation2 + $0x2]] }
  0x4e   : > { %s587_s10 = sld [smem:[#allocation2 + $0x3]] }
  0x4f   : > { %s588_s11 = sld [smem:[#allocation2 + $0x80]] }
  0x50   : > { %v282_v2 = vstv %s281_s8  ;;  %s589_s12 = sld [smem:[#allocation7 + $0x1]] }
  0x51   : > { %v283_v4 = vmul.f32 %v282_v2, %v271_v0  ;;  %v285_v5 = vstv %s284_s24  ;;  %s590_s13 = sld [smem:[#allocation2 + $0x81]]  ;;  %s1071_s24 = scalar_lea.vmem [#allocation9], %s579_s0 }
  0x52   : > { %v288_v7 = vstv %s585_s22  ;;  %s591_s25 = sld [smem:[#allocation2 + $0x82]]  ;;  %s405_s0 = sshll.u32 %s1071_s24, 4  ;;  %s1086_s0 = int_to_ptr.vmem [resolvable:$true] %s405_s0 }
  0x53   : > { %v286_v8 = vadd.f32 %v285_v5, %v283_v4  ;;  %v289_v9 = vmul.f32 %v1055_v1, %v288_v7  ;;  %v292_v10 = vstv %s586_s30  ;;  %s592_s5 = sld [smem:[#allocation2 + $0x83]] }
  0x54   : > { %v293_v11 = vmul.f32 %v1057_v3, %v292_v10  ;;  %v296_v12 = vstv %s587_s10  ;;  %s594_s14 = sld [smem:[#allocation2 + $0x100]] }
  0x55   : > { %v290_v13 = vadd.f32 %v289_v9, %v286_v8  ;;  %v297_v14 = vmul.f32 %v1059_v6, %v296_v12  ;;  %v301_v15 = vstv %s588_s11  ;;  %s595_s29 = sld [smem:[#allocation7 + $0x2]]  ;;  %s614_s11 = sshll.u32 %s883_s18, 7 }
  0x56   : > { %v302_v16 = vmul.f32 %v301_v15, %v271_v0  ;;  %v304_v17 = vstv %s589_s12  ;;  %s596_s21 = sld [smem:[#allocation2 + $0x101]] }
  0x57   : > { %v294_v18 = vadd.f32 %v293_v11, %v290_v13  ;;  %v307_v19 = vstv %s590_s13  ;;  %s597_s23 = sld [smem:[#allocation2 + $0x102]] }
  0x58   : > { %v305_v20 = vadd.f32 %v304_v17, %v302_v16  ;;  %v308_v21 = vmul.f32 %v1055_v1, %v307_v19  ;;  %v311_v22 = vstv %s591_s25  ;;  %s598_s28 = sld [smem:[#allocation2 + $0x103]]  ;;  %s1091_s25 = scalar_lea.hbm %s1168_s3, %s614_s11 }
  0x59   : > { %v1065_v23 = vadd.f32 %v297_v14, %v294_v18  ;;  %v312_v24 = vmul.f32 %v1057_v3, %v311_v22  ;;  %v315_v25 = vstv %s592_s5  ;;  %s600_s6 = sld [smem:[#allocation2 + $0x180]]  ;;  %s386_s5 = scalar_lea.sflag [#allocation4], %s1045_s1 }
  0x5a   : > { %v309_v26 = vadd.f32 %v308_v21, %v305_v20  ;;  %v316_v27 = vmul.f32 %v1059_v6, %v315_v25  ;;  %v322_v28 = vstv %s594_s14  ;;  %s601_s8 = sld [smem:[#allocation7 + $0x3]]  ;;  %s773_s14 = scalar_lea.vmem %s1086_s0, 128 }
  0x5b   : > { %299 = vst [vmem:[%s1071_s24] sm:$0x3] %v1065_v23  ;;  %v323_v29 = vmul.f32 %v322_v28, %v271_v0  ;;  %v325_v30 = vstv %s595_s29  ;;  %s602_s22 = sld [smem:[#allocation2 + $0x181]]  ;;  %p774_p3 = scmp.ne.s32.totalorder %s1086_s0, %s773_s14 }
  0x5c   : > { %v313_v31 = vadd.f32 %v312_v24, %v309_v26  ;;  %v328_v32 = vstv %s596_s21  ;;  %s603_s30 = sld [smem:[#allocation2 + $0x182]]  ;;  %s898_s29 = smov [#allocation9]  }
  0x5d   : > { %v326_v33 = vadd.f32 %v325_v30, %v323_v29  ;;  %v329_v34 = vmul.f32 %v1055_v1, %v328_v32  ;;  %v332_v35 = vstv %s597_s23  ;;  %s604_s10 = sld [smem:[#allocation2 + $0x183]]  ;;  %p775_p13 = pnand %p774_p3, %p1182_p7 }
  0x5e   : > { %v317_v36 = vadd.f32 %v316_v27, %v313_v31  ;;  %v333_v37 = vmul.f32 %v1057_v3, %v332_v35  ;;  %v336_v38 = vstv %s598_s28  ;;  %s777_s21 = sshll.u32 %s898_s29, 4  ;;  %s778_s21 = int_to_ptr.vmem [resolvable:$false] %s777_s21 }
  0x5f   : > { %v330_v39 = vadd.f32 %v329_v34, %v326_v33  ;;  %v337_v40 = vmul.f32 %v1059_v6, %v336_v38  ;;  %v343_v41 = vstv %s600_s6  ;;  %p776_p4 = pneg %p775_p13  ;;  %s779_s23 = scalar_lea.vmem %s778_s21, 256 }
  0x60   : > { %593 = vst [vmem:[%s1071_s24 + $0x2] sm:$0x3] %v317_v36  ;;  %v344_v42 = vmul.f32 %v343_v41, %v271_v0  ;;  %v346_v43 = vstv %s601_s8  ;;  %v320_v46 = vmax.f32 %v1065_v23, %v317_v36  ;;  %p780_p0 = scmp.lt.s32.totalorder %s1086_s0, %s778_s21  ;;  %p781_p9 = scmp.lt.s32.totalorder %s779_s23, %s773_s14 }
  0x61   : > { %v334_v44 = vadd.f32 %v333_v37, %v330_v39  ;;  %v349_v45 = vstv %s602_s22 }
  0x62   : > { %v347_v47 = vadd.f32 %v346_v43, %v344_v42  ;;  %v350_v48 = vmul.f32 %v1055_v1, %v349_v45  ;;  %v353_v49 = vstv %s603_s30  ;;  %p782_p12 = por %p781_p9, %p780_p0 }
  0x63   : > { %v338_v50 = vadd.f32 %v337_v40, %v334_v44  ;;  %v354_v51 = vmul.f32 %v1057_v3, %v353_v49  ;;  %v357_v52 = vstv %s604_s10 }
  0x64   : > { %v351_v53 = vadd.f32 %v350_v48, %v347_v47  ;;  %v358_v54 = vmul.f32 %v1059_v6, %v357_v52  ;;  %p783_p2 = pnand %p782_p12, %p776_p4 }
  0x65   : > { %599 = vst [vmem:[%s1071_s24 + $0x4] sm:$0x3] %v338_v50  ;;  %v341_v55 = vmax.f32 %v320_v46, %v338_v50 }
  0x66   : > { %v355_v56 = vadd.f32 %v354_v51, %v351_v53 }
  0x68   : > { %v359_v57 = vadd.f32 %v358_v54, %v355_v56 }
  0x6a   : > { %605 = vst [vmem:[%s1071_s24 + $0x6] sm:$0x3] %v359_v57  ;;  %v362_v58 = vmax.f32 %v341_v55, %v359_v57 }
  0x6b   : > { %786 = shalt.err (!%p783_p2)
}
  0x6c   : > { %s787_s28 = scalar_lea.hbm %s1091_s25, 128  ;;  %s791_s24 = scalar_lea.hbm %s1168_s3, 256 }
  0x6d   : > { %p788_p8 = scmp.ne.s32.totalorder %s1091_s25, %s787_s28  ;;  %p792_p10 = scmp.lt.s32.totalorder %s1091_s25, %s1168_s3 }
  0x6e   : > { %p793_p11 = scmp.lt.s32.totalorder %s791_s24, %s787_s28 }
  0x6f   : > { %p789_p5 = pnand %p788_p8, %p1182_p7 }
  0x70   : > { %p794_p1 = por %p793_p11, %p792_p10 }
  0x71   : > { %p790_p6 = pneg %p789_p5 }
  0x73   : > { %p795_p3 = pnand %p794_p1, %p790_p6 }
  0x75   : > { %798 = shalt.err (!%p795_p3)
}
  0x76   : > { %s899_s10 = smov 32   ;;  %s900_s11 = smov 2   ;;  %v363_v59 = vsub.f32 %v1065_v23, %v362_v58  ;;  %v366_v60 = vsub.f32 %v317_v36, %v362_v58  ;;  %v370_v61 = vsub.f32 %v338_v50, %v362_v58  ;;  %v374_v62 = vsub.f32 %v359_v57, %v362_v58 }
  0x77   : > { %625 = dma.vmem_to_hbm [thread:$0]  (%p1182_p7), %s1086_s0, 128, %s1091_s25, %s386_s5, %s899_s10, %s899_s10, %s900_s11  }
  0x78   : > { %v364_v63 = vmul.f32 1.442695, %v363_v59  ;;  %v367_v0 = vmul.f32 1.442695, %v366_v60  ;;  %v371_v1 = vmul.f32 1.442695, %v370_v61 }
  0x79   : > { %v375_v2 = vmul.f32 1.442695, %v374_v62  ;;  %s581_s0 = sshll.u32 %s1045_s1, 1  ;;  %s610_s25 = sshll.u32 %s883_s18, 5 }
  0x7a   : > { %707 = vpow2.f32 %v364_v63  ;;  %s270_s12 = scalar_lea.vmem [#allocation10], %s581_s0  ;;  %s420_s29 = scalar_lea.hbm %s1169_s4, %s610_s25 }
  0x7b   : > { %709 = vpow2.f32 %v367_v0  ;;  %s422_s13 = sshll.u32 %s270_s12, 4  ;;  %s391_s21 = scalar_lea.sflag [#allocation11], %s1045_s1  ;;  %s1120_s13 = int_to_ptr.vmem [resolvable:$true] %s422_s13 }
  0x7c   : > { %711 = vpow2.f32 %v371_v1  ;;  %s799_s23 = scalar_lea.vmem %s1120_s13, 32  ;;  %s901_s28 = smov [#allocation10]  }
  0x7d   : > { %713 = vpow2.f32 %v375_v2  ;;  %p800_p13 = scmp.ne.s32.totalorder %s1120_s13, %s799_s23  ;;  %s803_s6 = sshll.u32 %s901_s28, 4  ;;  %s804_s6 = int_to_ptr.vmem [resolvable:$false] %s803_s6 }
  0x7e   : > { %s805_s18 = scalar_lea.vmem %s804_s6, 64  ;;  %p806_p9 = scmp.lt.s32.totalorder %s1120_s13, %s804_s6 }
  0x7f   : > { %p801_p4 = pnand %p800_p13, %p1182_p7  ;;  %p807_p12 = scmp.lt.s32.totalorder %s805_s18, %s799_s23 }
  0x81   : > { %p802_p0 = pneg %p801_p4  ;;  %p808_p2 = por %p807_p12, %p806_p9 }
  0x83   : > { %p809_p8 = pnand %p808_p2, %p802_p0 }
  0x87   : > { %v708_v3 = vpop.eup %707 }
  0x88   : > { %v710_v4 = vpop.eup %709 }
  0x89   : > { %v712_v5 = vpop.eup %711  ;;  %v369_v6 = vadd.f32 %v710_v4, %v708_v3 }
  0x8a   : > { %v714_v7 = vpop.eup %713 }
  0x8b   : > { %v373_v8 = vadd.f32 %v712_v5, %v369_v6 }
  0x8d   : > { %v377_v9 = vadd.f32 %v714_v7, %v373_v8 }
  0x8f   : > { %715 = vlog2.f32 %v377_v9 }
  0x9c   : > { %v716_v10 = vpop.eup %715 }
  0x9d   : > { %v379_v11 = vmul.f32 0.6931472, %v716_v10 }
  0x9f   : > { %v380_v12 = vmul.f32 -0.8, %v379_v11 }
  0xa1   : > { %v381_v13 = vmul.f32 1.442695, %v380_v12 }
  0xa3   : > { %717 = vpow2.f32 %v381_v13 }
  0xb0   : > { %v718_v14 = vpop.eup %717 }
  0xb1   : > { %384 = vst [vmem:[%s270_s12] sm:$0x3] %v718_v14 }
  0xb2   : > { %812 = shalt.err (!%p809_p8)
}
  0xb3   : > { %s813_s8 = scalar_lea.hbm %s420_s29, 32  ;;  %s817_s22 = scalar_lea.hbm %s1169_s4, 64 }
  0xb4   : > { %p814_p5 = scmp.ne.s32.totalorder %s420_s29, %s813_s8  ;;  %p818_p11 = scmp.lt.s32.totalorder %s420_s29, %s1169_s4 }
  0xb5   : > { %p819_p1 = scmp.lt.s32.totalorder %s817_s22, %s813_s8 }
  0xb6   : > { %p815_p6 = pnand %p814_p5, %p1182_p7 }
  0xb7   : > { %p820_p3 = por %p819_p1, %p818_p11 }
  0xb8   : > { %p816_p10 = pneg %p815_p6 }
  0xba   : > { %p821_p13 = pnand %p820_p3, %p816_p10 }
  0xbc   : > { %824 = shalt.err (!%p821_p13)
}
  0xbd   : > { %626 = dma.vmem_to_hbm [thread:$0]  (%p1182_p7), %s1120_s13, 32, %s420_s29, %s391_s21  }
  0xbe PF: > { %s434_s11 = sand.u32 1, %s871_s15   ;;  %p1183_p4 = scmp.ne.s32.totalorder %s1176_s27, 0 }
  0xbf   : > { %p1184_p0 = scmp.ge.s32.totalorder %s891_s20, 2  ;;  %s435_s0 = scalar_lea.sflag [#allocation4], %s434_s11 }
  0xc1   : > { %p641_p9 = pnand %p1184_p0, %p1183_p4 }
  0xc3   : > { %p642_p12 = pneg %p641_p9 }
  0xc5   : > { %862 = dma.done.wait (%p642_p12), %s435_s0, 128  }
  0xc6   : > { %864 = vsyncadd (%p642_p12), %s435_s0, 4294967168  ;;  %s444_s12 = scalar_lea.sflag [#allocation11], %s434_s11 }
  0xc7   : > { %866 = dma.done.wait (%p642_p12), %s444_s12, 32  }
  0xc8   : > { %868 = vsyncadd (%p642_p12), %s444_s12, 4294967264  ;;  %s26_s20 = sadd.s32 1, %s891_s20   ;;  %s1185_s15 = smov %s875_s16 }
  0xc9   : > { %p23_p2 = scmp.ge.s32.totalorder %s26_s20, 4   ;;  %s1186_s16 = smov %s879_s17 }
  0xca   : > { %s1187_s17 = smov %s1028_s7  ;;  %s1188_s18 = smov %s887_s19 }
  0xcb   : > { %s1189_s19 = smov %s1191_s9  ;;  %25 = sbr.rel (!%p23_p2) target bundleno = 13 (0xd), region = 110 }
  0xd0   :  { %449 = vsyncpa [#allocation3], 1 }
  0xd1   :  { %451 = vsyncpa [#allocation3 + $0x1], 1 }
  0xd2   :  { %452 = vsyncpa [#allocation4], 1 }
  0xd3   :  { %454 = vsyncpa [#allocation4 + $0x1], 1 }
  0xd4   :  { %455 = vsyncpa [#allocation11], 1 }
  0xd5   :  { %457 = vsyncpa [#allocation11 + $0x1], 1 }
  0xd6   :  { %458 = vsyncpa [#allocation5], 1 }
  0xd7   :  { %460 = vsyncpa [#allocation5 + $0x1], 1 }
  0xd8   :  { %461 = vsyncpa [#allocation6], 1 }
  0xd9   :  { %463 = vsyncpa [#allocation6 + $0x1], 1 }

</bundles_post_ra>
